<compile_context>
chip_gen: v5e
topology: v5e:2x2
jax: 0.10.0
libtpu: 0.0.40
codegen_flags: <defaults>
</compile_context>

<pallas_src>
import jax
import jax.numpy as jnp
from jax.experimental import pallas as pl
from jax.experimental.pallas import tpu as pltpu


# Target bytes for one *input* block on the NB-batched small-plane path.  2 MiB in +
# 2 MiB out, double-buffered, is ~8 MiB -- safe under v5e's 16 MiB default scoped VMEM
# (and we raise vmem_limit_bytes explicitly below anyway).
# TODO(synk): could be raised to 8-16 MiB on v6e (128 MiB physical VMEM) for fewer grid steps.
_NB_TARGET_BYTES = 2 << 20


def _transpose_tile_kernel(x_ref, o_ref):
    # TODO(synk): bf16/int8 fast path -- pltpu.bitcast lane-pairs (quads) into u32
    # containers, transpose the 32-bit tile, then unpack; halves/quarters the XLU vxpose
    # count for packed dtypes.  f32 (the common case here) is unaffected.
    x = x_ref[...]
    if x.ndim == 2:
        # Leading block dim squeezed: one (TH, TW) tile -> (TW, TH) on the XLU.
        o_ref[...] = x.T
    else:
        # Batched small-plane tile: (NB, H, W) -> (NB, W, H).
        o_ref[...] = jnp.transpose(x, (0, 2, 1))


def _dtype_tile_cap(itemsize):
    """Lane-axis tile cap (elements) so a contiguous DMA row stays >= 2 KiB."""
    return max(128, (2048 // itemsize) // 128 * 128)


def _pick_hw_tile(dim, cap):
    """Tile for one of the last two dims.

    Legal tiles are multiples of 128 (aligned for both the input tile and the transposed
    output tile) or the full extent `dim` (block dim == array dim).  Preference order:
      1. dim <= cap            -> full extent (single block, VMEM bounded by the cap).
      2. exact 128-multiple tile t dividing dim with t > cap/2 (no padded blocks).
      3. ragged: tile = cap-sized 128-multiple; grid uses pl.cdiv and Pallas pads the
         input edge block / masks out-of-bounds output writes.
    """
    if dim <= cap:
        return dim
    if dim % 128 == 0:
        t = cap
        while t >= 128:
            if dim % t == 0:
                break
            t -= 128
        if t >= 128 and t * 2 > cap:
            return t
    return min(cap, pl.cdiv(dim, 128) * 128)


def _pick_batch(n_planes, plane_bytes):
    """How many whole planes to batch per grid step on the small-plane path."""
    target = max(1, _NB_TARGET_BYTES // max(plane_bytes, 1))
    target = min(n_planes, target)
    # Prefer an exact divisor of N close to the target; otherwise use a ragged batch
    # (pl.cdiv grid, padded last batch block) so prime/awkward N doesn't collapse to 1.
    for d in range(target, 0, -1):
        if n_planes % d == 0:
            if 2 * d > target:
                return d
            break
    return target


def _transpose_last_3d(x3):
    """x3: (N, H, W) -> (N, W, H) via a tiled Pallas transpose."""
    N, H, W = x3.shape
    itemsize = x3.dtype.itemsize
    cap = _dtype_tile_cap(itemsize)

    TH = _pick_hw_tile(H, cap)
    TW = _pick_hw_tile(W, cap)

    # Batch several whole planes per grid step when the plane is small, to amortize the
    # ~0.35 us per-grid-step overhead and keep DMAs reasonably sized.
    NB = 1
    if TH == H and TW == W:
        plane_bytes = H * W * itemsize
        if plane_bytes <= _NB_TARGET_BYTES:
            NB = _pick_batch(N, plane_bytes)

    grid = (pl.cdiv(N, NB), pl.cdiv(H, TH), pl.cdiv(W, TW))

    if NB == 1:
        in_block = (pl.Squeezed(), TH, TW)
        out_block = (pl.Squeezed(), TW, TH)
    else:
        in_block = (NB, TH, TW)
        out_block = (NB, TW, TH)

    in_spec = pl.BlockSpec(in_block, lambda n, hi, wi: (n, hi, wi))
    out_spec = pl.BlockSpec(out_block, lambda n, hi, wi: (n, wi, hi))

    # Explicit VMEM budget: double-buffered input + output blocks, 2x slack for Mosaic
    # scratch / transpose temporaries; floored at the known-safe 32 MiB and capped at
    # v7x's 64 MiB physical VMEM.
    blk_bytes = NB * TH * TW * itemsize
    vmem_limit = int(min(max(8 * blk_bytes + (4 << 20), 32 << 20), 64 << 20))

    return pl.pallas_call(
        _transpose_tile_kernel,
        out_shape=jax.ShapeDtypeStruct((N, W, H), x3.dtype),
        grid_spec=pltpu.PrefetchScalarGridSpec(
            num_scalar_prefetch=0,
            grid=grid,
            in_specs=[in_spec],
            out_specs=out_spec,
        ),
        compiler_params=pltpu.CompilerParams(
            # Every (n, hi, wi) writes a distinct output block (no cross-step carry),
            # so all axes are parallel; on v7x both TensorCores get work even when N == 1.
            dimension_semantics=("parallel", "parallel", "parallel"),
            vmem_limit_bytes=vmem_limit,
        ),
        # Pure memory traffic: read + write every element exactly once.
        cost_estimate=pl.CostEstimate(
            flops=0, transcendentals=0, bytes_accessed=2 * N * H * W * itemsize
        ),
    )(x3)


def transpose_last(x, deconstruct_idx=None, transpose_dim=-2, *, force_pallas=False):
    """Pallas implementation of TransposeLast.forward (arbitrary rank >= 2)."""
    if deconstruct_idx is not None:
        x = x[deconstruct_idx]

    assert x.ndim >= 2, "TransposeLast needs at least 2 dims"
    td = transpose_dim if transpose_dim >= 0 else x.ndim + transpose_dim
    if td != x.ndim - 2:
        # TODO(synk): non-default transpose_dim (swap of a non-adjacent axis with -1) is a
        # pure layout permute; left to XLA rather than lowered to the Pallas kernel.
        return jnp.swapaxes(x, transpose_dim, -1)

    lead = x.shape[:-2]
    H, W = x.shape[-2], x.shape[-1]

    # Lane-density heuristic (perf review): when either swapped dim is < 128 the Pallas
    # loads/stores are masked (vst.msk) and waste most of the 128 lanes, while XLA can
    # usually fold a pure layout swap into the producer/consumer for free.
    # force_pallas=True keeps the NB-batched Pallas path (used by the small-shape demo).
    if not force_pallas and min(H, W) < 128:
        return jnp.swapaxes(x, -2, -1)

    N = 1
    for d in lead:
        N *= d

    y3 = _transpose_last_3d(x.reshape(N, H, W))
    return y3.reshape(*lead, W, H)


if __name__ == "__main__":
    key = jax.random.PRNGKey(0)
    k1, k2, k3, k4 = jax.random.split(key, 4)

    # 1) Small NCHW input: NB-batched small-plane Pallas path (one grid step, (8,16,16) tile).
    x1 = jax.random.normal(k1, (2, 4, 16, 16), dtype=jnp.float32)
    y1 = jax.block_until_ready(transpose_last(x1, force_pallas=True))
    assert y1.shape == (2, 4, 16, 16)
    assert bool(jnp.array_equal(y1, jnp.swapaxes(x1, -2, -1)))

    # 2) 128-multiple plane: exact-tiled path with swapped (hi, wi) output tile indices.
    x2 = jax.random.normal(k2, (2, 512, 1024), dtype=jnp.float32)
    y2 = jax.block_until_ready(transpose_last(x2))
    assert y2.shape == (2, 1024, 512)
    assert bool(jnp.array_equal(y2, jnp.swapaxes(x2, -2, -1)))

    # 3) Non-128-multiple W: ragged edge block via pl.cdiv grid (tile 512, valid width 712).
    x3 = jax.random.normal(k3, (1, 256, 712), dtype=jnp.float32)
    y3 = jax.block_until_ready(transpose_last(x3))
    assert y3.shape == (1, 712, 256)
    assert bool(jnp.array_equal(y3, jnp.swapaxes(x3, -2, -1)))

    # 4) bf16: dtype-aware (1024-element) tile cap, single full-plane block.
    x4 = jax.random.normal(k4, (1, 256, 1024), dtype=jnp.bfloat16)
    y4 = jax.block_until_ready(transpose_last(x4))
    assert y4.shape == (1, 1024, 256)
    assert bool(jnp.array_equal(y4, jnp.swapaxes(x4, -2, -1)))

    print("KERNEL_OK")
</pallas_src>

<mosaic_0001>
module attributes {stable_mosaic.version = 11 : i64} {
  func.func @_transpose_tile_kernel(%arg0: i32, %arg1: i32, %arg2: i32, %arg3: memref<8x16x16xf32, #tpu.memory_space<vmem>>, %arg4: memref<8x16x16xf32, #tpu.memory_space<vmem>>) attributes {dimension_semantics = [#tpu.dimension_semantics<parallel>, #tpu.dimension_semantics<parallel>, #tpu.dimension_semantics<parallel>], iteration_bounds = array<i64: 1, 1, 1>, scalar_prefetch = 0 : i64, scratch_operands = 0 : i64, tpu.core_type = #tpu.core_type<tc>, window_params = [{transform_indices = @transform_0, window_bounds = array<i64: 8, 16, 16>}, {transform_indices = @transform_1, window_bounds = array<i64: 8, 16, 16>}]} {
    %c0 = arith.constant 0 : index
    %c0_0 = arith.constant 0 : index
    %c0_1 = arith.constant 0 : index
    %0 = vector.load %arg3[%c0, %c0_0, %c0_1] : memref<8x16x16xf32, #tpu.memory_space<vmem>>, vector<8x16x16xf32>
    %1 = tpu.transpose %0, [0, 2, 1] : vector<8x16x16xf32> -> vector<8x16x16xf32>
    %c0_2 = arith.constant 0 : index
    %c0_3 = arith.constant 0 : index
    %c0_4 = arith.constant 0 : index
    %2 = vector.load %arg4[%c0_2, %c0_3, %c0_4] : memref<8x16x16xf32, #tpu.memory_space<vmem>>, vector<8x16x16xf32>
    tpu.vector_store %arg4[%c0_2, %c0_3, %c0_4], %1 {strides = array<i32>} : memref<8x16x16xf32, #tpu.memory_space<vmem>>, vector<8x16x16xf32>,
    return
  }
  func.func @transform_0(%arg0: i32, %arg1: i32, %arg2: i32) -> (i32, i32, i32) {
    %c0_i32 = arith.constant 0 : i32
    return %arg0, %arg1, %arg2 : i32, i32, i32
  }
  func.func @transform_1(%arg0: i32, %arg1: i32, %arg2: i32) -> (i32, i32, i32) {
    %c0_i32 = arith.constant 0 : i32
    return %arg0, %arg2, %arg1 : i32, i32, i32
  }
}

</mosaic_0001>

<bundles_post_ra>
// kernel: tpu_custom_call.1
= control target key start
LH: loop header
LB: loop body
LE: loop exit
PB: predicated region body
PF: predicated region fallthrough
CT: control target
= control target key end

     0   :  { %6 = vsyncpa [#allocation3], 0  ;;  %s432_s0 = inlined_call_operand.hbm [shape: f32[8,16,16], index: 0, kind: input, shape index: {}]   ;;  %s433_s1 = inlined_call_operand.hbm [shape: f32[8,16,16], index: 1, kind: output, shape index: {}]  }
   0x1   :  { %7 = vsyncpa [#allocation4], 0  ;;  %s12_s8 = sshll.u32 %s432_s0, 4  ;;  %s390_s9 = smov [#allocation2]   ;;  %s13_s8 = int_to_ptr.hbm [resolvable:$true] %s12_s8 }
   0x2   :  { %s14_s10 = sshll.u32 %s390_s9, 4  ;;  %s391_s11 = smov 128   ;;  %s15_s10 = int_to_ptr.vmem [resolvable:$true] %s14_s10 }
   0x3   :  { %s392_s12 = smov 8  }
   0x4   :  { %20 = dma.hbm_to_vmem [thread:$0]  %s13_s8, 2048, %s15_s10, [#allocation3], %s391_s11, %s391_s11, %s392_s12  }
   0x5   :  { %386 = dma.done.wait [#allocation3], 2048  }
   0x6   :  { %387 = vsyncadd [#allocation3], 4294965248  ;;  %v27_v0 = vld [vmem:[#allocation2 + $0x10] sm:$0xff]  ;;  %v25_v1 = vld [vmem:[#allocation2] sm:$0xff]  ;;  %vm297_vm0 = vcmask 130048   ;;  %s393_s0 = smov [#allocation5]  }
   0x7   :  { %73 = vxpose.xlu1.b32.start [1/2] (short) (narrow) %v27_v0, 16  ;;  %41 = vxpose.xlu0.b32.start [1/2] (short) (narrow) %v25_v1, 16  ;;  %v29_v2 = vld [vmem:[#allocation2 + $0x20] sm:$0xff]  ;;  %v28_v3 = vld [vmem:[#allocation2 + $0x18] sm:$0xff]  ;;  %v26_v4 = vld [vmem:[#allocation2 + $0x8] sm:$0xff]  ;;  %s318_s13 = sshll.u32 %s393_s0, 4  ;;  %s319_s13 = int_to_ptr.vmem [resolvable:$true] %s318_s13 }
   0x8   :  { %105 = vxpose.xlu2.b32.start [1/2] (short) (narrow) %v29_v2, 16  ;;  %v30_v5 = vld [vmem:[#allocation2 + $0x28] sm:$0xff]  ;;  %v33_v6 = vld [vmem:[#allocation2 + $0x40] sm:$0xff]  ;;  %v31_v7 = vld [vmem:[#allocation2 + $0x30] sm:$0xff]  ;;  %s320_s16 = sshll.u32 %s433_s1, 4  ;;  %s321_s16 = int_to_ptr.hbm [resolvable:$true] %s320_s16 }
   0x9   :  { %v35_v8 = vld [vmem:[#allocation2 + $0x50] sm:$0xff]  ;;  %v34_v9 = vld [vmem:[#allocation2 + $0x48] sm:$0xff]  ;;  %v32_v10 = vld [vmem:[#allocation2 + $0x38] sm:$0xff] }
   0xa   :  { %v36_v11 = vld [vmem:[#allocation2 + $0x58] sm:$0xff]  ;;  %v39_v12 = vld [vmem:[#allocation2 + $0x70] sm:$0xff]  ;;  %v37_v13 = vld [vmem:[#allocation2 + $0x60] sm:$0xff] }
   0xb   :  { %v40_v14 = vld [vmem:[#allocation2 + $0x78] sm:$0xff]  ;;  %v38_v15 = vld [vmem:[#allocation2 + $0x68] sm:$0xff] }
   0xf   :  { %74 = vxpose.xlu1.b32.end [2/2] (short) (narrow) %v28_v3, 16  ;;  %42 = vxpose.xlu0.b32.end [2/2] (short) (narrow) %v26_v4, 16 }
  0x10   :  { %106 = vxpose.xlu2.b32.end [2/2] (short) (narrow) %v30_v5, 16 }
  0x17   :  { %169 = vxpose.xlu1.b32.start [1/2] (short) (narrow) %v33_v6, 16  ;;  %137 = vxpose.xlu0.b32.start [1/2] (short) (narrow) %v31_v7, 16 }
  0x18   :  { %201 = vxpose.xlu2.b32.start [1/2] (short) (narrow) %v35_v8, 16 }
  0x1f   :  { %170 = vxpose.xlu1.b32.end [2/2] (short) (narrow) %v34_v9, 16  ;;  %138 = vxpose.xlu0.b32.end [2/2] (short) (narrow) %v32_v10, 16 }
  0x20   :  { %202 = vxpose.xlu2.b32.end [2/2] (short) (narrow) %v36_v11, 16 }
  0x27   :  { %265 = vxpose.xlu1.b32.start [1/2] (short) (narrow) %v39_v12, 16  ;;  %233 = vxpose.xlu0.b32.start [1/2] (short) (narrow) %v37_v13, 16 }
  0x2f   :  { %266 = vxpose.xlu1.b32.end [2/2] (short) (narrow) %v40_v14, 16  ;;  %234 = vxpose.xlu0.b32.end [2/2] (short) (narrow) %v38_v15, 16 }
  0xa1   :  { %v121_v16 = vpop.trf.xlu2 }
  0xa2   :  { %302 = vst.msk [vmem:[#allocation5 + $0x20] sm:$0xff] %vm297_vm0, %v121_v16 }
  0xa9   :  { %v122_v17 = vpop.trf.xlu2 }
  0xaa   :  { %303 = vst.msk [vmem:[#allocation5 + $0x28] sm:$0xff] %vm297_vm0, %v122_v17 }
  0xab   :  { %v89_v18 = vpop.trf.xlu1  ;;  %v57_v19 = vpop.trf.xlu0 }
  0xac   :  { %300 = vst.msk [vmem:[#allocation5 + $0x10] sm:$0xff] %vm297_vm0, %v89_v18 }
  0xad   :  { %298 = vst.msk [vmem:[#allocation5] sm:$0xff] %vm297_vm0, %v57_v19 }
  0xb1   :  { %v217_v20 = vpop.trf.xlu2 }
  0xb2   :  { %308 = vst.msk [vmem:[#allocation5 + $0x50] sm:$0xff] %vm297_vm0, %v217_v20 }
  0xb3   :  { %v90_v21 = vpop.trf.xlu1  ;;  %v58_v22 = vpop.trf.xlu0 }
  0xb4   :  { %301 = vst.msk [vmem:[#allocation5 + $0x18] sm:$0xff] %vm297_vm0, %v90_v21 }
  0xb5   :  { %299 = vst.msk [vmem:[#allocation5 + $0x8] sm:$0xff] %vm297_vm0, %v58_v22 }
  0xb9   :  { %v218_v23 = vpop.trf.xlu2 }
  0xba   :  { %309 = vst.msk [vmem:[#allocation5 + $0x58] sm:$0xff] %vm297_vm0, %v218_v23 }
  0xbb   :  { %v185_v24 = vpop.trf.xlu1  ;;  %v153_v25 = vpop.trf.xlu0 }
  0xbc   :  { %306 = vst.msk [vmem:[#allocation5 + $0x40] sm:$0xff] %vm297_vm0, %v185_v24 }
  0xbd   :  { %304 = vst.msk [vmem:[#allocation5 + $0x30] sm:$0xff] %vm297_vm0, %v153_v25 }
  0xc3   :  { %v186_v26 = vpop.trf.xlu1  ;;  %v154_v27 = vpop.trf.xlu0 }
  0xc4   :  { %307 = vst.msk [vmem:[#allocation5 + $0x48] sm:$0xff] %vm297_vm0, %v186_v26 }
  0xc5   :  { %305 = vst.msk [vmem:[#allocation5 + $0x38] sm:$0xff] %vm297_vm0, %v154_v27 }
  0xcb   :  { %v281_v28 = vpop.trf.xlu1  ;;  %v249_v29 = vpop.trf.xlu0 }
  0xcc   :  { %312 = vst.msk [vmem:[#allocation5 + $0x70] sm:$0xff] %vm297_vm0, %v281_v28 }
  0xcd   :  { %310 = vst.msk [vmem:[#allocation5 + $0x60] sm:$0xff] %vm297_vm0, %v249_v29 }
  0xd3   :  { %v282_v30 = vpop.trf.xlu1  ;;  %v250_v31 = vpop.trf.xlu0 }
  0xd4   :  { %313 = vst.msk [vmem:[#allocation5 + $0x78] sm:$0xff] %vm297_vm0, %v282_v30 }
  0xd5   :  { %311 = vst.msk [vmem:[#allocation5 + $0x68] sm:$0xff] %vm297_vm0, %v250_v31 }
  0xd6   :  { %326 = dma.vmem_to_hbm [thread:$0]  %s319_s13, 2048, %s321_s16, [#allocation4], %s391_s11, %s391_s11, %s392_s12  }
  0xd7   :  { %388 = dma.done.wait [#allocation4], 2048  }
  0xd8   :  { %389 = vsyncadd [#allocation4], 4294965248 }
  0xd9   :  { %331 = vsyncpa [#allocation3], 1 }
  0xda   :  { %332 = vsyncpa [#allocation4], 1 }

</bundles_post_ra>
